<compile_context>
chip_gen: v7x
topology: tpu7x:2x2x1
jax: 0.10.0
libtpu: 0.0.40
codegen_flags: <defaults>
</compile_context>

<pallas_src>
import math
import functools

import jax
import jax.numpy as jnp
from jax.experimental import pallas as pl
from jax.experimental.pallas import tpu as pltpu

F32 = jnp.float32
BF = jnp.bfloat16

# non-pipelined, whole-array VMEM residency for grid-invariant weights
_WVMEM = pl.BlockSpec(memory_space=pltpu.MemorySpace.VMEM)


def _vmem_limit():
    """Generation-aware scoped-VMEM limit (~75% of physical capacity)."""
    cap = 64 * 1024 * 1024
    try:
        info = pltpu.get_tpu_info()
        c = getattr(info, "vmem_capacity_bytes", None)
        if c:
            cap = int(c)
    except Exception:
        pass
    return min(int(cap * 3 // 4), 100 * 1024 * 1024)


VMEM_LIMIT = _vmem_limit()


def _t_tile(n, max_tile=1024):
    """Largest row tile <= max_tile that divides n and is a multiple of 8."""
    if n <= max_tile:
        return n
    for t in range(max_tile - max_tile % 8, 7, -8):
        if n % t == 0:
            return t
    return n


# ----------------------------------------------------------- in-kernel math ---

def _adaln(x, cond_bf, we_ref, be_ref, wsb_ref, bsb_ref, D):
    """AdaLayerNorm: LN(x) * (1 + scale(cond)) + shift(cond).  Stats in f32.
    scale/shift produced by ONE fused (D, 2D) matmul, split at a 128-aligned
    column."""
    emb = jnp.dot(cond_bf, we_ref[...], preferred_element_type=F32) + be_ref[...]
    emb = emb * jax.nn.sigmoid(emb)                              # SiLU
    ss = jnp.dot(emb.astype(BF), wsb_ref[...],
                 preferred_element_type=F32) + bsb_ref[...]      # (T, 2D)
    scale = ss[:, :D]
    shift = ss[:, D:]
    mean = jnp.mean(x, axis=-1, keepdims=True)
    var = jnp.mean(jnp.square(x - mean), axis=-1, keepdims=True)
    xn = (x - mean) * jax.lax.rsqrt(var + 1e-5)                  # LN, no affine
    return xn * (1.0 + scale) + shift


# ------------------------------------------------------ fused per-layer kernel

def _layer_kernel(num_heads, K,
                  x_ref, c_ref, dp_ref,
                  cw, cb,
                  a1we, a1be, a1wsb, a1bsb,
                  f1w1, f1b1, f1w2, f1b2,
                  a2we, a2be, a2wsb, a2bsb,
                  wqkv, bqkv, wo, bo,
                  a3we, a3be, a3wsb, a3bsb,
                  pw1w, pw1b, dww, dwb, bns, bnh, pw2w, pw2b,
                  a4we, a4be, a4wsb, a4bsb,
                  f2w1, f2b1, f2w2, f2b2,
                  lng, lnb,
                  o_ref):
    x = x_ref[0]                                   # (T, D) f32
    cond = c_ref[0]                                # (T, D) bf16 (cast in wrapper)
    T, D = x.shape
    hd = D // num_heads

    # ---- inject diffusion + cond projections -------------------------------
    cproj = jnp.dot(cond, cw[...], preferred_element_type=F32) + cb[...]
    x = x + dp_ref[0] + cproj                      # diffusion broadcast in-kernel

    # ---- FFN1 (half-step) ---------------------------------------------------
    h = _adaln(x, cond, a1we, a1be, a1wsb, a1bsb, D)
    h = jnp.dot(h.astype(BF), f1w1[...], preferred_element_type=F32) + f1b1[...]
    h = h * jax.nn.sigmoid(h)                      # SiLU
    h = jnp.dot(h.astype(BF), f1w2[...], preferred_element_type=F32) + f1b2[...]
    x = 0.5 * h + x

    # ---- Self-attention ------------------------------------------------------
    h = _adaln(x, cond, a2we, a2be, a2wsb, a2bsb, D)
    hb = h.astype(BF)
    # single fused QKV projection; softmax scale pre-folded into Q weights/bias
    qkv = jnp.dot(hb, wqkv[...], preferred_element_type=F32) + bqkv[...]   # (T,3D)
    q = qkv[:, :D].astype(BF)
    k = qkv[:, D:2 * D].astype(BF)
    v = qkv[:, 2 * D:].astype(BF)
    dn = (((1,), (1,)), ((), ()))                  # contract head_dim axis
    heads = []
    for hh in range(num_heads):                    # static unroll over heads
        sl = slice(hh * hd, (hh + 1) * hd)
        s = jax.lax.dot_general(q[:, sl], k[:, sl], dn,
                                preferred_element_type=F32)       # (T, T) f32
        m = jnp.max(s, axis=-1, keepdims=True)
        p = jnp.exp(s - m)
        denom = jnp.sum(p, axis=-1, keepdims=True)
        p = (p * pl.reciprocal(denom, approx=True)).astype(BF)    # EUP recip
        heads.append(jnp.dot(p, v[:, sl], preferred_element_type=F32).astype(BF))
    attn = jnp.concatenate(heads, axis=-1)                         # (T, D)
    x = jnp.dot(attn, wo[...], preferred_element_type=F32) + bo[...] + x

    # ---- Convolution module --------------------------------------------------
    h = _adaln(x, cond, a3we, a3be, a3wsb, a3bsb, D)
    # pointwise conv (kernel 1) as ONE (D, 2D) matmul; GLU split is 128-aligned
    h1 = jnp.dot(h.astype(BF), pw1w[...], preferred_element_type=F32) + pw1b[...]
    hg = h1[:, :D] * jax.nn.sigmoid(h1[:, D:])     # GLU, (T, D) f32
    pad = (K - 1) // 2                             # K odd ('SAME' padding)
    w = dww[...]                                   # (K, D) f32 tap weights
    row = jax.lax.broadcasted_iota(jnp.int32, (T, D), 0)
    acc = jnp.zeros((T, D), F32)
    for kk in range(K):                            # static unroll over taps
        off = kk - pad                             # y[t] += w[kk] * hg[t + off]
        if off == 0:
            contrib = hg
        else:
            rolled = pltpu.roll(hg, (-off) % T, 0)     # XLU sublane rotate
            lo = max(0, -off)
            hi = min(T, T - off)
            valid = (row >= lo) & (row < hi)           # zero-pad edge mask
            contrib = jnp.where(valid, rolled, 0.0)
        acc = acc + contrib * w[kk:kk + 1, :]
    y = acc + dwb[...]                             # depthwise conv bias
    y = y * bns[...] + bnh[...]                    # BatchNorm1d (eval, folded)
    y = y * jax.nn.sigmoid(y)                      # SiLU
    y = jnp.dot(y.astype(BF), pw2w[...], preferred_element_type=F32) + pw2b[...]
    x = x + y                                      # residual

    # ---- FFN2 (half-step) + final LayerNorm ---------------------------------
    h = _adaln(x, cond, a4we, a4be, a4wsb, a4bsb, D)
    h = jnp.dot(h.astype(BF), f2w1[...], preferred_element_type=F32) + f2b1[...]
    h = h * jax.nn.sigmoid(h)
    h = jnp.dot(h.astype(BF), f2w2[...], preferred_element_type=F32) + f2b2[...]
    x = 0.5 * h + x
    mean = jnp.mean(x, axis=-1, keepdims=True)
    var = jnp.mean(jnp.square(x - mean), axis=-1, keepdims=True)
    o_ref[0] = (x - mean) * jax.lax.rsqrt(var + 1e-5) * lng[...] + lnb[...]


# --------------------------------------------------------- prologue kernels ---

def _input_proj_kernel(x_ref, w_ref, b_ref, pe_ref, o_ref):
    y = jnp.dot(x_ref[0].astype(BF), w_ref[...],
                preferred_element_type=F32) + b_ref[...]
    y = jnp.maximum(y, 0.0)                        # ReLU
    o_ref[0] = y + pe_ref[...]                     # positional encoding


def _diff_mlp_kernel(x_ref, w1_ref, b1_ref, w2_ref, b2_ref, o_ref):
    h = jnp.dot(x_ref[...].astype(BF), w1_ref[...],
                preferred_element_type=F32) + b1_ref[...]
    h = h * jnp.tanh(jax.nn.softplus(h))           # Mish
    o_ref[...] = jnp.dot(h.astype(BF), w2_ref[...],
                         preferred_element_type=F32) + b2_ref[...]


def _diff_proj_kernel(d_ref, w_ref, b_ref, o_ref):
    # one grid step per layer: per-layer diffusion projections of demb
    o_ref[0] = jnp.dot(d_ref[...].astype(BF), w_ref[0],
                       preferred_element_type=F32) + b_ref[0]


def _out_proj_kernel(x_ref, w_ref, b_ref, o_ref):
    o_ref[...] = jnp.dot(x_ref[...].astype(BF), w_ref[...],
                         preferred_element_type=F32) + b_ref[...]


# --------------------------------------------------------------- wrappers -----

def _input_proj(inp, params, T):
    B, _, in_dims = inp.shape
    D = params["d_model"]
    pe = params["pe"][:T]                                           # (T, D)
    xs = pl.BlockSpec((1, T, in_dims), lambda b: (b, 0, 0))
    os = pl.BlockSpec((1, T, D), lambda b: (b, 0, 0))
    return pl.pallas_call(
        _input_proj_kernel,
        out_shape=jax.ShapeDtypeStruct((B, T, D), F32),
        grid=(B,),
        in_specs=[xs, _WVMEM, _WVMEM, _WVMEM],
        out_specs=os,
        compiler_params=pltpu.CompilerParams(
            dimension_semantics=("parallel",), vmem_limit_bytes=VMEM_LIMIT),
    )(inp, params["in_w"], params["in_b"], pe)


def _diff_mlp(de, params):
    B = de.shape[0]
    D = params["d_model"]
    return pl.pallas_call(
        _diff_mlp_kernel,
        out_shape=jax.ShapeDtypeStruct((B, D), F32),
        in_specs=[_WVMEM] * 5,
        out_specs=_WVMEM,
        compiler_params=pltpu.CompilerParams(vmem_limit_bytes=VMEM_LIMIT),
    )(de, params["mlp_w1"], params["mlp_b1"], params["mlp_w2"], params["mlp_b2"])


def _diff_proj_all(demb, params):
    L = params["diff_w"].shape[0]
    B, D = demb.shape
    return pl.pallas_call(
        _diff_proj_kernel,
        out_shape=jax.ShapeDtypeStruct((L, B, D), F32),
        grid=(L,),
        in_specs=[_WVMEM,
                  pl.BlockSpec((1, D, D), lambda l: (l, 0, 0)),
                  pl.BlockSpec((1, 1, D), lambda l: (l, 0, 0))],
        out_specs=pl.BlockSpec((1, B, D), lambda l: (l, 0, 0)),
        compiler_params=pltpu.CompilerParams(
            dimension_semantics=("parallel",), vmem_limit_bytes=VMEM_LIMIT),
    )(demb, params["diff_w"], params["diff_b"])


def _layer_forward(x, cond_bf, dp, lp, num_heads, K):
    B, T, D = x.shape
    xs = pl.BlockSpec((1, T, D), lambda b: (b, 0, 0))
    dps = pl.BlockSpec((1, 1, D), lambda b: (b, 0, 0))
    a1, a2 = lp["ffn1_adaln"], lp["attn_adaln"]
    a3, a4 = lp["conv_adaln"], lp["ffn2_adaln"]
    weights = (
        lp["cond_w"], lp["cond_b"],
        a1["we"], a1["be"], a1["wsb"], a1["bsb"],
        lp["ffn1_w1"], lp["ffn1_b1"], lp["ffn1_w2"], lp["ffn1_b2"],
        a2["we"], a2["be"], a2["wsb"], a2["bsb"],
        lp["wqkv"], lp["bqkv"], lp["wo"], lp["bo"],
        a3["we"], a3["be"], a3["wsb"], a3["bsb"],
        lp["pw1_w"], lp["pw1_b"], lp["dw_w"], lp["dw_b"],
        lp["bn_scale"], lp["bn_shift"], lp["pw2_w"], lp["pw2_b"],
        a4["we"], a4["be"], a4["wsb"], a4["bsb"],
        lp["ffn2_w1"], lp["ffn2_b1"], lp["ffn2_w2"], lp["ffn2_b2"],
        lp["final_ln_g"], lp["final_ln_b"],
    )
    in_specs = [xs, xs, dps] + [_WVMEM] * len(weights)
    return pl.pallas_call(
        functools.partial(_layer_kernel, num_heads, K),
        out_shape=jax.ShapeDtypeStruct((B, T, D), F32),
        grid=(B,),
        in_specs=in_specs,
        out_specs=xs,
        compiler_params=pltpu.CompilerParams(
            dimension_semantics=("parallel",), vmem_limit_bytes=VMEM_LIMIT),
    )(x, cond_bf, dp, *weights)


def _out_proj(x, params):
    B, T, D = x.shape
    x2 = x.reshape(B * T, D)
    N = B * T
    tR = _t_tile(N, 1024)
    Dp = params["out_w"].shape[1]                                   # 128-padded
    y = pl.pallas_call(
        _out_proj_kernel,
        out_shape=jax.ShapeDtypeStruct((N, Dp), F32),
        grid=(N // tR,),
        in_specs=[pl.BlockSpec((tR, D), lambda i: (i, 0)), _WVMEM, _WVMEM],
        out_specs=pl.BlockSpec((tR, Dp), lambda i: (i, 0)),
        compiler_params=pltpu.CompilerParams(
            dimension_semantics=("parallel",), vmem_limit_bytes=VMEM_LIMIT),
    )(x2, params["out_w"], params["out_b"])
    return y.reshape(B, T, Dp)


# ----------------------------------------------------------------- forward ----

def cond_conformer_forward(params, inp, diffusion_step, cond1, cond2=None):
    """inp: (B, T, in_dims); diffusion_step: (B,); cond1/cond2: (B, T, d_model)."""
    B, T, _ = inp.shape
    D = params["d_model"]
    H = params["num_heads"]
    K = params["K"]
    assert (K - 1) // 2 < T, "depthwise kernel must be narrower than sequence"

    cond = cond1 if cond2 is None else cond1 + cond2                # (B, T, D)
    cond_bf = cond.astype(BF)                                       # cast once

    # SinusoidalPosEmb (pe_scale=1) + MLP (Linear -> Mish -> Linear)
    half = D // 2
    freqs = jnp.exp(jnp.arange(half, dtype=F32) * (-math.log(10000.0) / (half - 1)))
    de = diffusion_step[:, None] * freqs[None, :]
    de = jnp.concatenate([jnp.sin(de), jnp.cos(de)], axis=-1)       # (B, D)
    demb = _diff_mlp(de, params)                                    # (B, D)

    # per-layer diffusion projections, all layers in one gridded kernel
    dproj_all = _diff_proj_all(demb, params)                        # (L, B, D)

    x = _input_proj(inp, params, T)                                 # (B, T, D)

    for li, lp in enumerate(params["layers"]):
        dp = dproj_all[li][:, None, :]                              # (B, 1, D)
        x = _layer_forward(x, cond_bf, dp, lp, H, K)                # fused layer

    y = _out_proj(x, params)                                        # (B, T, Dp)
    return y[..., :params["out_dims"]]                              # (B, T, out)


# ----------------------------------------------------------- parameter init ---

def init_params(key, in_dims, d_model, out_dims, ffn_dim, cond_dim,
                num_layers, K, num_heads, max_len=64):
    keys = iter(jax.random.split(key, 8192))
    nk = lambda: next(keys)
    D, H = d_model, num_heads
    hd = D // H

    def w(din, dout, scale=0.05):
        return (jax.random.normal(nk(), (din, dout), F32) * scale).astype(BF)

    def b(dout, scale=0.02):
        return (jax.random.normal(nk(), (dout,), F32) * scale).reshape(1, dout)

    def adaln_p(cdim, d):
        # fused [scale | shift] weight (d, 2d) — torch chunks scale first
        wl = jax.random.normal(nk(), (d, 2 * d), F32) * 0.05
        bl = jax.random.normal(nk(), (2 * d,), F32) * 0.02
        return {"we": w(cdim, d), "be": b(d),
                "wsb": wl.astype(BF), "bsb": bl.reshape(1, 2 * d)}

    def layer_p():
        # attention: fused QKV with 1/sqrt(hd) folded into the Q columns/bias
        sc = 1.0 / math.sqrt(hd)
        wq = jax.random.normal(nk(), (D, D), F32) * 0.05
        wk = jax.random.normal(nk(), (D, D), F32) * 0.05
        wv = jax.random.normal(nk(), (D, D), F32) * 0.05
        bq = jax.random.normal(nk(), (D,), F32) * 0.02
        bk = jax.random.normal(nk(), (D,), F32) * 0.02
        bv = jax.random.normal(nk(), (D,), F32) * 0.02
        wqkv = jnp.concatenate([wq * sc, wk, wv], axis=1).astype(BF)   # (D, 3D)
        bqkv = jnp.concatenate([bq * sc, bk, bv]).reshape(1, 3 * D)

        gamma = 1.0 + jax.random.normal(nk(), (D,), F32) * 0.01
        beta = jax.random.normal(nk(), (D,), F32) * 0.01
        rm, rv = jnp.zeros((D,), F32), jnp.ones((D,), F32)
        bn_scale = gamma * jax.lax.rsqrt(rv + 1e-5)
        bn_shift = beta - rm * bn_scale
        return {
            "cond_w": w(D, D), "cond_b": b(D),
            "ffn1_adaln": adaln_p(cond_dim, D),
            "ffn1_w1": w(D, ffn_dim), "ffn1_b1": b(ffn_dim),
            "ffn1_w2": w(ffn_dim, D), "ffn1_b2": b(D),
            "attn_adaln": adaln_p(cond_dim, D),
            "wqkv": wqkv, "bqkv": bqkv,
            "wo": (jax.random.normal(nk(), (D, D), F32) * 0.05).astype(BF),
            "bo": b(D),
            "conv_adaln": adaln_p(cond_dim, D),
            "pw1_w": w(D, 2 * D), "pw1_b": b(2 * D),       # fused GLU pointwise
            "dw_w": jax.random.normal(nk(), (K, D), F32) * 0.1,
            "dw_b": (jax.random.normal(nk(), (D,), F32) * 0.02).reshape(1, D),
            "bn_scale": bn_scale.reshape(1, D), "bn_shift": bn_shift.reshape(1, D),
            "pw2_w": w(D, D), "pw2_b": b(D),
            "ffn2_adaln": adaln_p(cond_dim, D),
            "ffn2_w1": w(D, ffn_dim), "ffn2_b1": b(ffn_dim),
            "ffn2_w2": w(ffn_dim, D), "ffn2_b2": b(D),
            "final_ln_g": (1.0 + jax.random.normal(nk(), (D,), F32) * 0.01).reshape(1, D),
            "final_ln_b": (jax.random.normal(nk(), (D,), F32) * 0.01).reshape(1, D),
        }

    layers, dws, dbs = [], [], []
    for _ in range(num_layers):
        dws.append(jax.random.normal(nk(), (D, D), F32) * 0.05)
        dbs.append(jax.random.normal(nk(), (D,), F32) * 0.02)
        layers.append(layer_p())
    diff_w = jnp.stack(dws).astype(BF)                              # (L, D, D)
    diff_b = jnp.stack(dbs).reshape(num_layers, 1, D)               # (L, 1, D)

    # final projection padded to a lane-dense (multiple-of-128) output width
    Dp = ((out_dims + 127) // 128) * 128
    ow = jax.random.normal(nk(), (D, out_dims), F32) * 0.05
    ob = jax.random.normal(nk(), (out_dims,), F32) * 0.02
    out_w = jnp.zeros((D, Dp), F32).at[:, :out_dims].set(ow).astype(BF)
    out_b = jnp.zeros((1, Dp), F32).at[0, :out_dims].set(ob)

    # PositionalEncoding buffer
    position = jnp.arange(max_len, dtype=F32)[:, None]
    div_term = jnp.exp(jnp.arange(0, D, 2, dtype=F32) * (-math.log(10000.0) / D))
    pe = jnp.zeros((max_len, D), F32)
    pe = pe.at[:, 0::2].set(jnp.sin(position * div_term))
    pe = pe.at[:, 1::2].set(jnp.cos(position * div_term))

    return {
        "num_heads": num_heads, "K": K, "d_model": D, "out_dims": out_dims,
        "in_w": w(in_dims, D), "in_b": b(D),
        "mlp_w1": w(D, 4 * D), "mlp_b1": b(4 * D),
        "mlp_w2": w(4 * D, D), "mlp_b2": b(D),
        "out_w": out_w, "out_b": out_b,
        "pe": pe,
        "diff_w": diff_w, "diff_b": diff_b,
        "layers": layers,
    }


# ---------------------------------------------------------------------- main --

if __name__ == "__main__":
    B, T = 2, 16
    in_dims, d_model, out_dims = 16, 128, 16
    num_heads, ffn_dim, cond_dim = 4, 256, 128    # cond_dim == d_model for 'ada'
    num_layers, K = 2, 3                          # K must be odd ('SAME' padding)

    key = jax.random.PRNGKey(0)
    kp, ki, kc, kd = jax.random.split(key, 4)
    params = init_params(kp, in_dims, d_model, out_dims, ffn_dim, cond_dim,
                         num_layers, K, num_heads)

    x = jax.random.normal(ki, (B, T, in_dims), F32)
    cond1 = jax.random.normal(kc, (B, T, d_model), F32)
    diffusion_step = jax.random.uniform(kd, (B,), F32) * 100.0

    out = cond_conformer_forward(params, x, diffusion_step, cond1)
    out = jax.block_until_ready(out)
    assert out.shape == (B, T, out_dims), out.shape
    assert bool(jnp.all(jnp.isfinite(out)))
    print("KERNEL_OK")
</pallas_src>

<mosaic_0001>
module attributes {stable_mosaic.version = 11 : i64} {
  func.func @_diff_mlp_kernel(%arg0: memref<2x128xf32, #tpu.memory_space<vmem>>, %arg1: memref<128x512xbf16, #tpu.memory_space<vmem>>, %arg2: memref<1x512xf32, #tpu.memory_space<vmem>>, %arg3: memref<512x128xbf16, #tpu.memory_space<vmem>>, %arg4: memref<1x128xf32, #tpu.memory_space<vmem>>, %arg5: memref<2x128xf32, #tpu.memory_space<vmem>>) attributes {dimension_semantics = [], scalar_prefetch = 0 : i64, scratch_operands = 0 : i64, tpu.core_type = #tpu.core_type<tc>} {
    %c0 = arith.constant 0 : index
    %c0_0 = arith.constant 0 : index
    %0 = vector.load %arg0[%c0, %c0_0] : memref<2x128xf32, #tpu.memory_space<vmem>>, vector<2x128xf32>
    %1 = arith.truncf %0 : vector<2x128xf32> to vector<2x128xbf16>
    %c0_1 = arith.constant 0 : index
    %c0_2 = arith.constant 0 : index
    %2 = vector.load %arg1[%c0_1, %c0_2] : memref<128x512xbf16, #tpu.memory_space<vmem>>, vector<128x512xbf16>
    %cst = arith.constant dense<0.000000e+00> : vector<2x512xf32>
    %3 = tpu.matmul %1, %2, %cst {dimension_numbers = #tpu.dot_dimension_numbers<[1], [0], [0], [1], [0, 0, 1, 1], [], []>} : vector<2x128xbf16>, vector<128x512xbf16>, vector<2x512xf32> -> vector<2x512xf32>
    %c0_3 = arith.constant 0 : index
    %c0_4 = arith.constant 0 : index
    %4 = vector.load %arg2[%c0_3, %c0_4] : memref<1x512xf32, #tpu.memory_space<vmem>>, vector<1x512xf32>
    %5 = vector.broadcast %4 : vector<1x512xf32> to vector<2x512xf32>
    %6 = arith.addf %3, %5 : vector<2x512xf32>
    %cst_5 = arith.constant 0.000000e+00 : f32
    %7 = vector.broadcast %cst_5 : f32 to vector<2x512xf32>
    %8 = arith.maximumf %6, %7 : vector<2x512xf32>
    %9 = vector.broadcast %cst_5 : f32 to vector<2x512xf32>
    %10 = arith.subf %6, %9 : vector<2x512xf32>
    %11 = arith.cmpf one, %10, %10 : vector<2x512xf32>
    %12 = vector.broadcast %cst_5 : f32 to vector<2x512xf32>
    %13 = arith.addf %6, %12 : vector<2x512xf32>
    %14 = math.absf %10 : vector<2x512xf32>
    %cst_6 = arith.constant 0.000000e+00 : f32
    %15 = vector.broadcast %cst_6 : f32 to vector<2x512xf32>
    %16 = arith.subf %15, %14 : vector<2x512xf32>
    %17 = math.exp %16 : vector<2x512xf32>
    %18 = math.log1p %17 : vector<2x512xf32>
    %19 = arith.addf %8, %18 : vector<2x512xf32>
    %20 = arith.select %11, %13, %19 : vector<2x512xi1>, vector<2x512xf32>
    %21 = math.tanh %20 : vector<2x512xf32>
    %22 = arith.mulf %6, %21 : vector<2x512xf32>
    %23 = arith.truncf %22 : vector<2x512xf32> to vector<2x512xbf16>
    %c0_7 = arith.constant 0 : index
    %c0_8 = arith.constant 0 : index
    %24 = vector.load %arg3[%c0_7, %c0_8] : memref<512x128xbf16, #tpu.memory_space<vmem>>, vector<512x128xbf16>
    %cst_9 = arith.constant dense<0.000000e+00> : vector<2x128xf32>
    %25 = tpu.matmul %23, %24, %cst_9 {dimension_numbers = #tpu.dot_dimension_numbers<[1], [0], [0], [1], [0, 0, 1, 1], [], []>} : vector<2x512xbf16>, vector<512x128xbf16>, vector<2x128xf32> -> vector<2x128xf32>
    %c0_10 = arith.constant 0 : index
    %c0_11 = arith.constant 0 : index
    %26 = vector.load %arg4[%c0_10, %c0_11] : memref<1x128xf32, #tpu.memory_space<vmem>>, vector<1x128xf32>
    %27 = vector.broadcast %26 : vector<1x128xf32> to vector<2x128xf32>
    %28 = arith.addf %25, %27 : vector<2x128xf32>
    %c0_12 = arith.constant 0 : index
    %c0_13 = arith.constant 0 : index
    %29 = vector.load %arg5[%c0_12, %c0_13] : memref<2x128xf32, #tpu.memory_space<vmem>>, vector<2x128xf32>
    tpu.vector_store %arg5[%c0_12, %c0_13], %28 {strides = array<i32>} : memref<2x128xf32, #tpu.memory_space<vmem>>, vector<2x128xf32>,
    return
  }
}

</mosaic_0001>

<bundles_post_ra>
// kernel: tpu_custom_call.1
= control target key start
LH: loop header
LB: loop body
LE: loop exit
PB: predicated region body
PF: predicated region fallthrough
CT: control target
= control target key end

     0   :  { %10 = vsyncpa [#allocation3], 0  ;;  %s1250_s0 = inlined_call_operand.hbm [shape: f32[2,128], index: 0, kind: input, shape index: {}]   ;;  %s1251_s1 = inlined_call_operand.hbm [shape: bf16[128,512], index: 1, kind: input, shape index: {}]   ;;  %s1252_s2 = inlined_call_operand.vmem [shape: f32[1,512], index: 2, kind: input, shape index: {}]   ;;  %s1253_s3 = inlined_call_operand.hbm [shape: bf16[512,128], index: 3, kind: input, shape index: {}]   ;;  %s1254_s4 = inlined_call_operand.vmem [shape: f32[1,128], index: 4, kind: input, shape index: {}]   ;;  %s1255_s5 = inlined_call_operand.hbm [shape: f32[2,128], index: 5, kind: output, shape index: {}]  }
   0x1   :  { %11 = vsyncpa [#allocation6], 0 }
   0x2   :  { %12 = vsyncpa [#allocation4], 0  ;;  %s1119_s18 = smov [#allocation5]   ;;  %s1025_s22 = scalar_lea.hbm %s1251_s1, 4096 }
   0x3   :  { %s28_s19 = sshll.u32 %s1119_s18, 4  ;;  %p1026_p0 = scmp.ne.s32.totalorder %s1251_s1, %s1025_s22  ;;  %s29_s19 = int_to_ptr.vmem [resolvable:$true] %s28_s19 }
   0x4   :  { %p1029_p1 = scmp.lt.u32.totalorder %s1025_s22, %s1251_s1 }
   0x6   :  { %p1031_p2 = pnand %p1029_p1, %p1026_p0 }
   0x8   :  { %1034 = shalt.err (!%p1031_p2)
}
   0x9   :  { %s1035_s27 = scalar_lea.vmem %s29_s19, 4096  ;;  %p1040_p4 = scmp.lt.s32.totalorder %s29_s19, %s29_s19 }
   0xa   :  { %p1036_p3 = scmp.ne.s32.totalorder %s29_s19, %s1035_s27  ;;  %p1041_p5 = scmp.lt.s32.totalorder %s1035_s27, %s1035_s27 }
   0xc   :  { %p1042_p6 = por %p1041_p5, %p1040_p4 }
   0xe   :  { %p1043_p7 = pnand %p1042_p6, %p1036_p3 }
  0x10   :  { %1046 = shalt.err (!%p1043_p7)
}
  0x11   :  { %s1120_s28 = smov 256   ;;  %s1121_s29 = smov 16  }
  0x12   :  { %34 = dma.hbm_to_vmem [thread:$0]  %s1251_s1, 4096, %s29_s19, [#allocation6], %s1120_s28, %s1120_s28, %s1121_s29  }
  0x13   :  { %s1122_s7 = smov [#allocation2]   ;;  %s1123_s9 = smov [#allocation7]  }
  0x14   :  { %s19_s8 = sshll.u32 %s1122_s7, 4  ;;  %s42_s10 = sshll.u32 %s1123_s9, 4  ;;  %s20_s8 = int_to_ptr.vmem [resolvable:$true] %s19_s8  ;;  %s43_s10 = int_to_ptr.vmem [resolvable:$true] %s42_s10 }
  0x15   :  { %s1047_s13 = scalar_lea.hbm %s1250_s0, 32 }
  0x16   :  { %p1048_p8 = scmp.ne.s32.totalorder %s1250_s0, %s1047_s13  ;;  %p1051_p9 = scmp.lt.u32.totalorder %s1047_s13, %s1250_s0 }
  0x18   :  { %p1053_p10 = pnand %p1051_p9, %p1048_p8 }
  0x1a   :  { %1056 = shalt.err (!%p1053_p10)
}
  0x1b   :  { %s1057_s1 = scalar_lea.vmem %s20_s8, 32  ;;  %p1062_p12 = scmp.lt.s32.totalorder %s20_s8, %s20_s8 }
  0x1c   :  { %p1058_p11 = scmp.ne.s32.totalorder %s20_s8, %s1057_s1  ;;  %p1063_p13 = scmp.lt.s32.totalorder %s1057_s1, %s1057_s1 }
  0x1e   :  { %p1064_p0 = por %p1063_p13, %p1062_p12 }
  0x20   :  { %p1065_p1 = pnand %p1064_p0, %p1058_p11 }
  0x22   :  { %1068 = shalt.err (!%p1065_p1)
}
  0x23   :  { %22 = dma.hbm_to_vmem [thread:$0]  %s1250_s0, 32, %s20_s8, [#allocation3]  }
  0x24   :  { %s1069_s22 = scalar_lea.hbm %s1253_s3, 4096 }
  0x25   :  { %p1070_p2 = scmp.ne.s32.totalorder %s1253_s3, %s1069_s22  ;;  %p1073_p3 = scmp.lt.u32.totalorder %s1069_s22, %s1253_s3 }
  0x27   :  { %p1075_p4 = pnand %p1073_p3, %p1070_p2 }
  0x29   :  { %1078 = shalt.err (!%p1075_p4)
}
  0x2a   :  { %s1079_s27 = scalar_lea.vmem %s43_s10, 4096  ;;  %p1084_p6 = scmp.lt.s32.totalorder %s43_s10, %s43_s10 }
  0x2b   :  { %p1080_p5 = scmp.ne.s32.totalorder %s43_s10, %s1079_s27  ;;  %p1085_p7 = scmp.lt.s32.totalorder %s1079_s27, %s1079_s27 }
  0x2d   :  { %p1086_p8 = por %p1085_p7, %p1084_p6 }
  0x2f   :  { %p1087_p9 = pnand %p1086_p8, %p1080_p5 }
  0x31   :  { %1090 = shalt.err (!%p1087_p9)
}
  0x32   :  { %s1124_s0 = smov 64   ;;  %s1125_s28 = smov 4  }
  0x33   :  { %48 = dma.hbm_to_vmem [thread:$0]  %s1253_s3, 4096, %s43_s10, [#allocation6], %s1124_s0, %s1124_s0, %s1125_s28  }
  0x34   :  { %1113 = dma.done.wait [#allocation3], 32  }
  0x35   :  { %1114 = vsyncadd [#allocation3], 4294967264 }
  0x36   :  { %1115 = dma.done.wait [#allocation6], 8192  }
  0x37   :  { %1116 = vsyncadd [#allocation6], 4294959104  ;;  %v1126_v0 = vmov 0   ;;  %v921_v1 = vld [vmem:[#allocation5 + $0x4] ss:$16 sps:$4 sm:$0xff]   ;;  %v973_v39 = vld [vmem:[#allocation7 + $0x48] sm:$0xff]  }
  0x38   :  { %309 = vmatprep.mubr.bf16.mxu0 %v1126_v0  ;;  %350 = vmatprep.mubr.bf16.mxu1 %v1126_v0  ;;  %v923_v2 = vld [vmem:[#allocation5 + $0xc] ss:$16 sps:$4 sm:$0xff]   ;;  %v925_v3 = vld [vmem:[#allocation5] ss:$16 sps:$4 sm:$0xff]   ;;  %v926_v4 = vld [vmem:[#allocation5 + $0x8] ss:$16 sps:$4 sm:$0xff]  }
  0x39   :  { %277 = vmatprep.subr.bf16.mxu0 %v921_v1  ;;  %318 = vmatprep.subr.bf16.mxu1 %v923_v2  ;;  %v927_v5 = vld [vmem:[#allocation5 + $0x24] ss:$16 sps:$4 sm:$0xff]   ;;  %v929_v6 = vld [vmem:[#allocation5 + $0x2c] ss:$16 sps:$4 sm:$0xff]   ;;  %v931_v7 = vld [vmem:[#allocation5 + $0x20] ss:$16 sps:$4 sm:$0xff]  }
  0x3a   :  { %278 = vmatpush1.bf16.msra.mxu0 %v925_v3  ;;  %319 = vmatpush1.bf16.msra.mxu1 %v926_v4  ;;  %v932_v8 = vld [vmem:[#allocation5 + $0x28] ss:$16 sps:$4 sm:$0xff]   ;;  %v933_v9 = vld [vmem:[#allocation5 + $0x44] ss:$16 sps:$4 sm:$0xff]   ;;  %v935_v10 = vld [vmem:[#allocation5 + $0x4c] ss:$16 sps:$4 sm:$0xff]   ;;  %v97_v3 = vlaneseq }
  0x3b   :  { %279 = vmatprep.subr.bf16.mxu0 %v927_v5  ;;  %320 = vmatprep.subr.bf16.mxu1 %v929_v6  ;;  %v937_v11 = vld [vmem:[#allocation5 + $0x40] ss:$16 sps:$4 sm:$0xff]   ;;  %v938_v12 = vld [vmem:[#allocation5 + $0x48] ss:$16 sps:$4 sm:$0xff]   ;;  %v939_v13 = vld [vmem:[#allocation5 + $0x64] ss:$16 sps:$4 sm:$0xff]  }
  0x3c   :  { %v941_v14 = vld [vmem:[#allocation5 + $0x6c] ss:$16 sps:$4 sm:$0xff]   ;;  %v943_v15 = vld [vmem:[#allocation5 + $0x60] ss:$16 sps:$4 sm:$0xff]   ;;  %v944_v16 = vld [vmem:[#allocation5 + $0x68] ss:$16 sps:$4 sm:$0xff]  }
  0x3d   :  { %v945_v17 = vld [vmem:[#allocation5 + $0x84] ss:$16 sps:$4 sm:$0xff]   ;;  %v947_v18 = vld [vmem:[#allocation5 + $0x8c] ss:$16 sps:$4 sm:$0xff]   ;;  %v949_v19 = vld [vmem:[#allocation5 + $0x80] ss:$16 sps:$4 sm:$0xff]  }
  0x3e   :  { %280 = vmatpush1.bf16.msra.mxu0 %v931_v7  ;;  %321 = vmatpush1.bf16.msra.mxu1 %v932_v8  ;;  %v950_v20 = vld [vmem:[#allocation5 + $0x88] ss:$16 sps:$4 sm:$0xff]   ;;  %v951_v21 = vld [vmem:[#allocation5 + $0xa4] ss:$16 sps:$4 sm:$0xff]   ;;  %v953_v22 = vld [vmem:[#allocation5 + $0xac] ss:$16 sps:$4 sm:$0xff]  }
  0x3f   :  { %281 = vmatprep.subr.bf16.mxu0 %v933_v9  ;;  %322 = vmatprep.subr.bf16.mxu1 %v935_v10  ;;  %v955_v23 = vld [vmem:[#allocation5 + $0xa0] ss:$16 sps:$4 sm:$0xff]   ;;  %v956_v24 = vld [vmem:[#allocation5 + $0xa8] ss:$16 sps:$4 sm:$0xff]   ;;  %v957_v25 = vld [vmem:[#allocation5 + $0xc4] ss:$16 sps:$4 sm:$0xff]  }
  0x40   :  { %v959_v26 = vld [vmem:[#allocation5 + $0xcc] ss:$16 sps:$4 sm:$0xff]   ;;  %v961_v27 = vld [vmem:[#allocation5 + $0xc0] ss:$16 sps:$4 sm:$0xff]   ;;  %v962_v28 = vld [vmem:[#allocation5 + $0xc8] ss:$16 sps:$4 sm:$0xff]  }
  0x41   :  { %v963_v29 = vld [vmem:[#allocation5 + $0xe4] ss:$16 sps:$4 sm:$0xff]   ;;  %v965_v30 = vld [vmem:[#allocation5 + $0xec] ss:$16 sps:$4 sm:$0xff]   ;;  %v967_v31 = vld [vmem:[#allocation5 + $0xe0] ss:$16 sps:$4 sm:$0xff]  }
  0x42   :  { %282 = vmatpush1.bf16.msra.mxu0 %v937_v11  ;;  %323 = vmatpush1.bf16.msra.mxu1 %v938_v12  ;;  %v968_v32 = vld [vmem:[#allocation5 + $0xe8] ss:$16 sps:$4 sm:$0xff]   ;;  %v61_v33 = vld [vmem:[#allocation2] sm:$0x3]  ;;  %v969_v35 = vld [vmem:[#allocation7 + $0x40] sm:$0xff]   ;;  %v98_v4 = vshrl.u32 %v97_v3, 7 }
  0x43   :  { %283 = vmatprep.subr.bf16.mxu0 %v939_v13  ;;  %324 = vmatprep.subr.bf16.mxu1 %v941_v14  ;;  %v62_v34 = vpack.c.bf16 %v61_v33, %v61_v33  ;;  %v970_v36 = vld [vmem:[#allocation7 + $0xc0] sm:$0xff]   ;;  %v974_v40 = vld [vmem:[#allocation7 + $0xc8] sm:$0xff]   ;;  %v977_v43 = vld [vmem:[#allocation7 + $0x50] sm:$0xff]   ;;  %s1127_s8 = smov [#allocation8]  }
  0x44   :  { %v971_v37 = vld [vmem:[#allocation7] sm:$0xff]   ;;  %v975_v41 = vld [vmem:[#allocation7 + $0x8] sm:$0xff]   ;;  %v978_v44 = vld [vmem:[#allocation7 + $0xd0] sm:$0xff]   ;;  %v99_v5 = vsub.s32 0, %v98_v4  ;;  %v107_v6 = vsub.s32 2, %v98_v4  ;;  %v103_v8 = vsub.s32 1, %v98_v4 }
  0x45   :  { %v972_v38 = vld [vmem:[#allocation7 + $0x80] sm:$0xff]   ;;  %v976_v42 = vld [vmem:[#allocation7 + $0x88] sm:$0xff]   ;;  %v979_v45 = vld [vmem:[#allocation7 + $0x10] sm:$0xff]   ;;  %v111_v9 = vsub.s32 3, %v98_v4  ;;  %s793_s9 = sshll.u32 %s1127_s8, 4  ;;  %s794_s9 = int_to_ptr.vmem [resolvable:$true] %s793_s9 }
  0x46   :  { %284 = vmatpush1.bf16.msra.mxu0 %v943_v15  ;;  %325 = vmatpush1.bf16.msra.mxu1 %v944_v16  ;;  %v980_v46 = vld [vmem:[#allocation7 + $0x90] sm:$0xff]   ;;  %v981_v47 = vld [vmem:[#allocation7 + $0x58] sm:$0xff]   ;;  %v985_v51 = vld [vmem:[#allocation7 + $0x60] sm:$0xff]   ;;  %s1091_s10 = scalar_lea.vmem %s794_s9, 32  ;;  %p1096_p11 = scmp.lt.s32.totalorder %s794_s9, %s794_s9 }
  0x47   :  { %285 = vmatprep.subr.bf16.mxu0 %v945_v17  ;;  %326 = vmatprep.subr.bf16.mxu1 %v947_v18  ;;  %v982_v48 = vld [vmem:[#allocation7 + $0xd8] sm:$0xff]   ;;  %v986_v52 = vld [vmem:[#allocation7 + $0xe0] sm:$0xff]   ;;  %v989_v55 = vld [vmem:[#allocation7 + $0x68] sm:$0xff]   ;;  %p1092_p10 = scmp.ne.s32.totalorder %s794_s9, %s1091_s10  ;;  %p1097_p12 = scmp.lt.s32.totalorder %s1091_s10, %s1091_s10 }
  0x48   :  { %v983_v49 = vld [vmem:[#allocation7 + $0x18] sm:$0xff]   ;;  %v987_v53 = vld [vmem:[#allocation7 + $0x20] sm:$0xff]   ;;  %v990_v56 = vld [vmem:[#allocation7 + $0xe8] sm:$0xff]  }
  0x49   :  { %v984_v50 = vld [vmem:[#allocation7 + $0x98] sm:$0xff]   ;;  %v988_v54 = vld [vmem:[#allocation7 + $0xa0] sm:$0xff]   ;;  %v991_v57 = vld [vmem:[#allocation7 + $0x28] sm:$0xff]   ;;  %p1098_p13 = por %p1097_p12, %p1096_p11 }
  0x4a   :  { %286 = vmatpush1.bf16.msra.mxu0 %v949_v19  ;;  %327 = vmatpush1.bf16.msra.mxu1 %v950_v20  ;;  %v992_v58 = vld [vmem:[#allocation7 + $0xa8] sm:$0xff]   ;;  %v993_v59 = vld [vmem:[#allocation7 + $0x70] sm:$0xff]   ;;  %v997_v63 = vld [vmem:[#allocation7 + $0x78] sm:$0xff]  }
  0x4b   :  { %287 = vmatprep.subr.bf16.mxu0 %v951_v21  ;;  %328 = vmatprep.subr.bf16.mxu1 %v953_v22  ;;  %v994_v60 = vld [vmem:[#allocation7 + $0xf0] sm:$0xff]   ;;  %v998_v0 = vld [vmem:[#allocation7 + $0xf8] sm:$0xff]   ;;  %p1099_p0 = pnand %p1098_p13, %p1092_p10 }
  0x4c   :  { %v995_v61 = vld [vmem:[#allocation7 + $0x30] sm:$0xff]   ;;  %v999_v1 = vld [vmem:[#allocation7 + $0x38] sm:$0xff]  }
  0x4d   :  { %v996_v62 = vld [vmem:[#allocation7 + $0xb0] sm:$0xff]   ;;  %v1000_v2 = vld [vmem:[#allocation7 + $0xb8] sm:$0xff]  }
  0x4e   :  { %288 = vmatpush1.bf16.msra.mxu0 %v955_v23  ;;  %329 = vmatpush1.bf16.msra.mxu1 %v956_v24  ;;  %v95_v7 = vld [vmem:[%s1252_s2] sm:$0xf] }
  0x4f   :  { %289 = vmatprep.subr.bf16.mxu0 %v957_v25  ;;  %330 = vmatprep.subr.bf16.mxu1 %v959_v26  ;;  %v100_v10 = vrot.slane %v95_v7, %v99_v5  ;;  %v108_v11 = vrot.slane %v95_v7, %v107_v6  ;;  %v104_v12 = vrot.slane %v95_v7, %v103_v8 }
  0x50   :  { %v112_v13 = vrot.slane %v95_v7, %v111_v9 }
  0x52   :  { %290 = vmatpush1.bf16.msra.mxu0 %v961_v27  ;;  %331 = vmatpush1.bf16.msra.mxu1 %v962_v28 }
  0x53   :  { %291 = vmatprep.subr.bf16.mxu0 %v963_v29  ;;  %332 = vmatprep.subr.bf16.mxu1 %v965_v30 }
  0x56   :  { %292 = vmatpush1.bf16.msra.mxu0 %v967_v31  ;;  %333 = vmatpush1.bf16.msra.mxu1 %v968_v32 }
  0x57   :  { %868 = vmatprep.subr.bf16.mxu0 %v969_v35  ;;  %890 = vmatprep.subr.bf16.mxu1 %v970_v36 }
  0x59   :  { %310 = vmatmul.mubr.bf16.vlgmr.msra.gmra.mrb[0].mxu0 %v62_v34  ;;  %351 = vmatmul.mubr.bf16.vlgmr.msra.gmra.mrb[0].mxu1 %v62_v34 }
  0x5a   :  { %869 = vmatpush3.bf16.msra.mxu0 %v971_v37  ;;  %891 = vmatpush3.bf16.msra.mxu1 %v972_v38 }
  0x5b   :  { %870 = vmatprep.subr.bf16.mxu0 %v973_v39  ;;  %892 = vmatprep.subr.bf16.mxu1 %v974_v40 }
  0x5e   :  { %871 = vmatpush3.bf16.msra.mxu0 %v975_v41  ;;  %893 = vmatpush3.bf16.msra.mxu1 %v976_v42 }
  0x5f   :  { %872 = vmatprep.subr.bf16.mxu0 %v977_v43  ;;  %894 = vmatprep.subr.bf16.mxu1 %v978_v44 }
  0x62   :  { %873 = vmatpush3.bf16.msra.mxu0 %v979_v45  ;;  %895 = vmatpush3.bf16.msra.mxu1 %v980_v46 }
  0x63   :  { %874 = vmatprep.subr.bf16.mxu0 %v981_v47  ;;  %896 = vmatprep.subr.bf16.mxu1 %v982_v48 }
  0x66   :  { %875 = vmatpush3.bf16.msra.mxu0 %v983_v49  ;;  %897 = vmatpush3.bf16.msra.mxu1 %v984_v50 }
  0x67   :  { %876 = vmatprep.subr.bf16.mxu0 %v985_v51  ;;  %898 = vmatprep.subr.bf16.mxu1 %v986_v52 }
  0x6a   :  { %877 = vmatpush3.bf16.msra.mxu0 %v987_v53  ;;  %899 = vmatpush3.bf16.msra.mxu1 %v988_v54 }
  0x6b   :  { %878 = vmatprep.subr.bf16.mxu0 %v989_v55  ;;  %900 = vmatprep.subr.bf16.mxu1 %v990_v56 }
  0x6e   :  { %879 = vmatpush3.bf16.msra.mxu0 %v991_v57  ;;  %901 = vmatpush3.bf16.msra.mxu1 %v992_v58 }
  0x6f   :  { %880 = vmatprep.subr.bf16.mxu0 %v993_v59  ;;  %902 = vmatprep.subr.bf16.mxu1 %v994_v60 }
  0x72   :  { %881 = vmatpush3.bf16.msra.mxu0 %v995_v61  ;;  %903 = vmatpush3.bf16.msra.mxu1 %v996_v62 }
  0x73   :  { %882 = vmatprep.subr.bf16.mxu0 %v997_v63  ;;  %904 = vmatprep.subr.bf16.mxu1 %v998_v0 }
  0x76   :  { %883 = vmatpush3.bf16.msra.mxu0 %v999_v1  ;;  %905 = vmatpush3.bf16.msra.mxu1 %v1000_v2 }
 0x12c   :  { %v311_v14 = vpop.f32.mrb[0].mxu0  ;;  %v352_v15 = vpop.f32.mrb[0].mxu1 }
 0x12d   :  { %v1197_v16 = vadd.f32 %v311_v14, %v100_v10  ;;  %v1199_v17 = vadd.f32 %v352_v15, %v108_v11  ;;  %v313_v18 = vpop.f32.mrb[1].mxu0  ;;  %v354_v19 = vpop.f32.mrb[1].mxu1 }
 0x12e   :  { %v1201_v20 = vadd.f32 %v313_v18, %v104_v12  ;;  %v1203_v21 = vadd.f32 %v354_v19, %v112_v13  ;;  %v315_v22 = vpop.f32.mrb[2].mxu0  ;;  %v356_v23 = vpop.f32.mrb[2].mxu1 }
 0x12f   :  { %v371_v24 = vand.u32 2147483647, %v1197_v16  ;;  %v316_v25 = vpop.f32.mrb[3].mxu0  ;;  %v357_v26 = vpop.f32.mrb[3].mxu1  ;;  %v373_v27 = vand.u32 2147483647, %v1199_v17  ;;  %vm363_vm0 = vcmp.ne.f32.partialorder %v1197_v16, %v1197_v16  ;;  %vm365_vm1 = vcmp.ne.f32.partialorder %v1199_v17, %v1199_v17 }
 0x130   :  { %v372_v29 = vand.u32 2147483647, %v1201_v20  ;;  %v374_v31 = vand.u32 2147483647, %v1203_v21  ;;  %v359_v56 = vmax.f32 %v1197_v16, 0.0  ;;  %v361_v57 = vmax.f32 %v1199_v17, 0.0 }
 0x131   :  { %v375_v28 = vsub.f32 0.0, %v371_v24  ;;  %v377_v30 = vsub.f32 0.0, %v373_v27  ;;  %v360_v9 = vmax.f32 %v1201_v20, 0.0  ;;  %v362_v18 = vmax.f32 %v1203_v21, 0.0 }
 0x132   :  { %v376_v33 = vsub.f32 0.0, %v372_v29  ;;  %v378_v35 = vsub.f32 0.0, %v374_v31  ;;  %vm364_vm6 = vcmp.ne.f32.partialorder %v1201_v20, %v1201_v20  ;;  %vm366_vm7 = vcmp.ne.f32.partialorder %v1203_v21, %v1203_v21 }
 0x133   :  { %v379_v32 = vmul.f32 1.442695, %v375_v28  ;;  %v383_v34 = vmul.f32 1.442695, %v377_v30 }
 0x134   :  { %v381_v36 = vmul.f32 1.442695, %v376_v33  ;;  %v385_v37 = vmul.f32 1.442695, %v378_v35 }
 0x135   :  { %1001 = vpow2.f32 %v379_v32 }
 0x136   :  { %1003 = vpow2.f32 %v383_v34 }
 0x137   :  { %1005 = vpow2.f32 %v381_v36 }
 0x138   :  { %1007 = vpow2.f32 %v385_v37 }
 0x13f   :  { %v1002_v38 = vpop.eup %1001 }
 0x140   :  { %v1004_v39 = vpop.eup %1003  ;;  %v387_v40 = vadd.f32 1.0, %v1002_v38  ;;  %v390_v46 = vmul.f32 -0.5, %v1002_v38  ;;  %v393_v51 = vand.u32 2147483647, %v1002_v38 }
 0x141   :  { %v1006_v41 = vpop.eup %1005  ;;  %v405_v42 = vadd.f32 1.0, %v1004_v39  ;;  %v408_v47 = vmul.f32 -0.5, %v1004_v39  ;;  %v411_v53 = vand.u32 2147483647, %v1004_v39 }
 0x142   :  { %v1008_v43 = vpop.eup %1007  ;;  %1009 = vlog2.f32 %v387_v40  ;;  %v396_v44 = vadd.f32 1.0, %v1006_v41  ;;  %v399_v48 = vmul.f32 -0.5, %v1006_v41  ;;  %v391_v49 = vadd.f32 1.0, %v390_v46 }
 0x143   :  { %1011 = vlog2.f32 %v405_v42  ;;  %v414_v45 = vadd.f32 1.0, %v1008_v43  ;;  %v417_v50 = vmul.f32 -0.5, %v1008_v43  ;;  %v409_v52 = vadd.f32 1.0, %v408_v47 }
 0x144   :  { %1013 = vlog2.f32 %v396_v44  ;;  %v400_v54 = vadd.f32 1.0, %v399_v48  ;;  %v402_v58 = vand.u32 2147483647, %v1006_v41  ;;  %v392_v61 = vmul.f32 %v1002_v38, %v391_v49 }
 0x145   :  { %1015 = vlog2.f32 %v414_v45  ;;  %v418_v62 = vadd.f32 1.0, %v417_v50  ;;  %vm394_vm2 = vcmp.lt.f32.partialorder %v393_v51, 0.0004427343  ;;  %v410_v1 = vmul.f32 %v1004_v39, %v409_v52 }
 0x146   :  { %v420_v2 = vand.u32 2147483647, %v1008_v43  ;;  %vm412_vm3 = vcmp.lt.f32.partialorder %v411_v53, 0.0004427343  ;;  %v401_v5 = vmul.f32 %v1006_v41, %v400_v54  ;;  %vm403_vm4 = vcmp.lt.f32.partialorder %v402_v58, 0.0004427343 }
 0x147   :  { %v419_v13 = vmul.f32 %v1008_v43, %v418_v62 }
 0x148   :  { %vm421_vm5 = vcmp.lt.f32.partialorder %v420_v2, 0.0004427343 }
 0x14c   :  { %v1010_v55 = vpop.eup %1009 }
 0x14d   :  { %v1012_v59 = vpop.eup %1011  ;;  %v389_v60 = vmul.f32 0.6931472, %v1010_v55 }
 0x14e   :  { %v1014_v63 = vpop.eup %1013  ;;  %v407_v0 = vmul.f32 0.6931472, %v1012_v59 }
 0x14f   :  { %v395_v3 = vsel %vm394_vm2, %v392_v61, %v389_v60  ;;  %v398_v4 = vmul.f32 0.6931472, %v1014_v63  ;;  %v1016_v6 = vpop.eup %1015 }
 0x150   :  { %v423_v7 = vadd.f32 %v395_v3, %v359_v56  ;;  %v413_v8 = vsel %vm412_vm3, %v410_v1, %v407_v0  ;;  %v416_v12 = vmul.f32 0.6931472, %v1016_v6 }
 0x151   :  { %v425_v10 = vadd.f32 %v413_v8, %v361_v57  ;;  %v404_v11 = vsel %vm403_vm4, %v401_v5, %v398_v4 }
 0x152   :  { %v427_v14 = vsel %vm363_vm0, %v1197_v16, %v423_v7  ;;  %v424_v15 = vadd.f32 %v404_v11, %v360_v9  ;;  %v422_v22 = vsel %vm421_vm5, %v419_v13, %v416_v12 }
 0x153   :  { %1017 = vtanh.f32 %v427_v14  ;;  %v429_v19 = vsel %vm365_vm1, %v1199_v17, %v425_v10  ;;  %v426_v24 = vadd.f32 %v422_v22, %v362_v18 }
 0x154   :  { %1019 = vtanh.f32 %v429_v19  ;;  %v428_v23 = vsel %vm364_vm6, %v1201_v20, %v424_v15 }
 0x155   :  { %1021 = vtanh.f32 %v428_v23  ;;  %v430_v25 = vsel %vm366_vm7, %v1203_v21, %v426_v24 }
 0x156   :  { %1023 = vtanh.f32 %v430_v25 }
 0x15d   :  { %v1018_v26 = vpop.eup %1017 }
 0x15e   :  { %v1020_v27 = vpop.eup %1019  ;;  %v435_v29 = vmul.f32 %v1018_v26, %v1197_v16  ;;  %v835_v16 = vld [vmem:[%s1254_s4] ss:$0 sm:$0xff] }
 0x15f   :  { %v1022_v28 = vpop.eup %1021  ;;  %v437_v32 = vmul.f32 %v1020_v27, %v1199_v17 }
 0x160   :  { %v436_v30 = vmul.f32 %v1022_v28, %v1201_v20  ;;  %v1024_v31 = vpop.eup %1023  ;;  %v439_v35 = vpack.c.bf16 %v435_v29, %v435_v29 }
 0x161   :  { %v438_v34 = vmul.f32 %v1024_v31, %v1203_v21  ;;  %v441_v37 = vpack.c.bf16 %v437_v32, %v437_v32 }
 0x162   :  { %v440_v33 = vpack.c.bf16 %v436_v30, %v436_v30 }
 0x163   :  { %v442_v36 = vpack.c.bf16 %v438_v34, %v438_v34 }
 0x164   :  { %738 = vmatprep.mubr.bf16.mxu0 %v440_v33 }
 0x165   :  { %739 = vmatmul.mubr.bf16.vlgmr.msra.gmra.mrb[4].mxu0 %v439_v35  ;;  %778 = vmatprep.mubr.bf16.mxu1 %v442_v36 }
 0x166   :  { %779 = vmatmul.mubr.bf16.vlgmr.msra.gmra.mrb[4].mxu1 %v441_v37 }
 0x238   :  { %v884_v38 = vpop.f32.mrb[4].mxu0 }
 0x239   :  { %v885_v39 = vpop.f32.mrb[5].mxu0  ;;  %v906_v20 = vpop.f32.mrb[4].mxu1 }
 0x23a   :  { %v886_v40 = vadd.f32 %v885_v39, %v884_v38  ;;  %v887_v41 = vpop.f32.mrb[6].mxu0  ;;  %v907_v17 = vpop.f32.mrb[5].mxu1 }
 0x23b   :  { %v888_v42 = vpop.f32.mrb[7].mxu0  ;;  %v908_v43 = vadd.f32 %v907_v17, %v906_v20  ;;  %v909_v44 = vpop.f32.mrb[6].mxu1 }
 0x23c   :  { %v741_v21 = vadd.f32 %v886_v40, %v835_v16  ;;  %v910_v45 = vpop.f32.mrb[7].mxu1 }
 0x23e   :  { %v781_v46 = vadd.f32 %v908_v43, %v741_v21 }
 0x240   :  { %786 = vst [vmem:[#allocation8] sm:$0x3] %v781_v46 }
 0x241   :  { %1102 = shalt.err (!%p1099_p0)
}
 0x242   :  { %s1103_s12 = scalar_lea.hbm %s1255_s5, 32 }
 0x243   :  { %p1104_p1 = scmp.ne.s32.totalorder %s1255_s5, %s1103_s12  ;;  %p1107_p2 = scmp.lt.u32.totalorder %s1103_s12, %s1255_s5 }
 0x245   :  { %p1109_p3 = pnand %p1107_p2, %p1104_p1 }
 0x247   :  { %1112 = shalt.err (!%p1109_p3)
}
 0x248   :  { %796 = dma.vmem_to_hbm [thread:$0]  %s794_s9, 32, %s1255_s5, [#allocation4]  }
 0x249   :  { %1117 = dma.done.wait [#allocation4], 32  }
 0x24a   :  { %1118 = vsyncadd [#allocation4], 4294967264 }
 0x24b   :  { %800 = vsyncpa [#allocation3], 1 }
 0x24c   :  { %801 = vsyncpa [#allocation6], 1 }
 0x24d   :  { %802 = vsyncpa [#allocation4], 1 }

</bundles_post_ra>
